<compile_context>
chip_gen: v5e
topology: v5e:2x2
jax: 0.10.0
libtpu: 0.0.40
codegen_flags: <defaults>
</compile_context>

<pallas_src>
import functools

import jax
import jax.numpy as jnp
from jax.experimental import pallas as pl
from jax.experimental.pallas import tpu as pltpu

_LANE = 128     # last-dim tile (vreg lanes)
_SUBLANE = 8    # second-to-last-dim tile (vreg sublanes)


def _round_up(n, m):
    return ((n + m - 1) // m) * m


# ----------------------------- Pallas kernel --------------------------------
def _fused_mlp_kernel(*refs, n_layers):
    """Entire MLP on one VMEM-resident batch tile.

    refs = (x_ref, w0, b0, w1, b1, ..., w_{L-1}, b_{L-1}, o_ref).
    Feature dims are pre-padded to multiples of 128; padding propagates as
    exact zeros through every layer (tanh(0) == 0), so no masks are needed.
    """
    x_ref, o_ref = refs[0], refs[-1]
    wb_refs = refs[1:-1]

    h = x_ref[...].astype(jnp.float32)
    for i in range(n_layers):          # static unroll (n_layers is small)
        w_ref = wb_refs[2 * i]
        b_ref = wb_refs[2 * i + 1]
        # (TB, Din_p) @ (Din_p, Dout_p) on the MXU, f32 accumulation.
        h = jnp.dot(h, w_ref[...], preferred_element_type=jnp.float32)
        h = h + b_ref[...]             # (1, Dout_p) broadcast, once per layer
        if i < n_layers - 1:
            h = jnp.tanh(h)            # EUP; last layer stays linear
    o_ref[...] = h.astype(o_ref.dtype)


# ------------------------------- Wrapper -------------------------------------
def mlp_forward(params, x, *, block_b=256):
    """Fused forward for the whole MLP in a single pallas_call.

    params: list of (w, b) with w: (Din, Dout), b: (Dout,).
    x: (B, in_dim). Returns (B, out_dim).
    """
    B, in_dim = x.shape
    n_layers = len(params)
    out_dim = params[-1][0].shape[1]

    dins = [w.shape[0] for w, _ in params]
    douts = [w.shape[1] for w, _ in params]
    assert dins[0] == in_dim
    for i in range(n_layers - 1):
        assert douts[i] == dins[i + 1]

    dins_p = [_round_up(d, _LANE) for d in dins]
    douts_p = [_round_up(d, _LANE) for d in douts]

    # Batch tiling: one "parallel" grid axis over batch tiles.
    tb = min(_round_up(block_b, _SUBLANE), _round_up(B, _SUBLANE))
    b_p = _round_up(B, tb)
    num_b_blocks = b_p // tb

    # Zero-pad to lane/sublane-dense shapes on the wrapper side.
    x_p = jnp.pad(x.astype(jnp.float32),
                  ((0, b_p - B), (0, dins_p[0] - in_dim)))
    flat_wb = []
    for (w, b), din, dout, din_p, dout_p in zip(params, dins, douts,
                                                dins_p, douts_p):
        flat_wb.append(jnp.pad(w.astype(jnp.float32),
                               ((0, din_p - din), (0, dout_p - dout))))
        flat_wb.append(jnp.pad(b.astype(jnp.float32),
                               (0, dout_p - dout)).reshape(1, dout_p))

    # BlockSpecs: the x / out batch tile moves with the grid; every weight and
    # bias is a single full block with a constant index_map (VMEM-resident
    # across all batch tiles).
    in_specs = [pl.BlockSpec((tb, dins_p[0]), lambda i: (i, 0))]
    for din_p, dout_p in zip(dins_p, douts_p):
        in_specs.append(pl.BlockSpec((din_p, dout_p), lambda i: (0, 0)))
        in_specs.append(pl.BlockSpec((1, dout_p), lambda i: (0, 0)))
    out_spec = pl.BlockSpec((tb, douts_p[-1]), lambda i: (i, 0))

    # Advisory cost estimate so XLA can schedule surrounding ops around us.
    mm = sum(dp * op for dp, op in zip(dins_p, douts_p))
    wb_bytes = 4 * sum(dp * op + op for dp, op in zip(dins_p, douts_p))
    cost = pl.CostEstimate(
        flops=2 * b_p * mm,
        transcendentals=b_p * sum(douts_p[:-1]),
        bytes_accessed=4 * b_p * (dins_p[0] + douts_p[-1]) + wb_bytes,
    )

    # VMEM budget: double-buffered batch tiles + resident weights + headroom,
    # kept under v7x's 64 MiB/TC physical VMEM.
    vmem_needed = 2 * (4 * tb * (dins_p[0] + douts_p[-1]) + wb_bytes)
    vmem_limit = int(min(max(vmem_needed + (4 << 20), 32 << 20), 64 << 20))

    kernel = functools.partial(_fused_mlp_kernel, n_layers=n_layers)
    out_p = pl.pallas_call(
        kernel,
        out_shape=jax.ShapeDtypeStruct((b_p, douts_p[-1]), jnp.float32),
        grid=(num_b_blocks,),
        in_specs=in_specs,
        out_specs=out_spec,
        compiler_params=pltpu.CompilerParams(
            dimension_semantics=("parallel",),
            vmem_limit_bytes=vmem_limit,
        ),
        cost_estimate=cost,
    )(x_p, *flat_wb)

    return out_p[:B, :out_dim]


# --------------------------- Parameter creation ------------------------------
def make_mlp_params(key, in_dim, hidden_dim, out_dim, num_hiddens,
                    last_layer_init_scale=1.0):
    """Mirrors MLP.__init__: Linear(in,hid), num_hiddens x Linear(hid,hid),
    Linear(hid,out); orthogonal(std=sqrt(2)) weights (last layer std =
    last_layer_init_scale), zero biases."""
    dims = [in_dim] + [hidden_dim] * (num_hiddens + 1) + [out_dim]
    n_layers = len(dims) - 1  # == num_hiddens + 2, matching the PyTorch module
    stds = [float(jnp.sqrt(2.0))] * (n_layers - 1) + [last_layer_init_scale]
    params = []
    keys = jax.random.split(key, n_layers)
    for k, din, dout, std in zip(keys, dims[:-1], dims[1:], stds):
        # orthogonal init over the (out, in) matrix like PyTorch, then transpose
        w_oi = jax.nn.initializers.orthogonal(scale=std)(k, (dout, din),
                                                         jnp.float32)
        params.append((w_oi.T, jnp.zeros((dout,), jnp.float32)))
    return params


# ------------------------------ Reference ------------------------------------
def mlp_reference(params, x):
    n = len(params)
    for i, (w, b) in enumerate(params):
        x = x @ w + b
        if i < n - 1:
            x = jnp.tanh(x)
    return x


if __name__ == "__main__":
    key = jax.random.PRNGKey(0)
    k_param, k_x = jax.random.split(key)

    # small shapes consistent with the module
    batch, in_dim, hidden_dim, out_dim, num_hiddens = 8, 16, 32, 4, 2

    params = make_mlp_params(k_param, in_dim, hidden_dim, out_dim,
                             num_hiddens, last_layer_init_scale=1.0)
    x = jax.random.normal(k_x, (batch, in_dim), jnp.float32)

    out = mlp_forward(params, x)
    out = jax.block_until_ready(out)

    ref = mlp_reference(params, x)
    assert out.shape == (batch, out_dim)
    assert jnp.allclose(out, ref, atol=1e-4, rtol=1e-4), "mismatch vs reference"

    print("KERNEL_OK")
</pallas_src>

<mosaic_0001>
module attributes {stable_mosaic.version = 11 : i64} {
  func.func @_fused_mlp_kernel(%arg0: i32, %arg1: memref<8x128xf32, #tpu.memory_space<vmem>>, %arg2: memref<128x128xf32, #tpu.memory_space<vmem>>, %arg3: memref<1x128xf32, #tpu.memory_space<vmem>>, %arg4: memref<128x128xf32, #tpu.memory_space<vmem>>, %arg5: memref<1x128xf32, #tpu.memory_space<vmem>>, %arg6: memref<128x128xf32, #tpu.memory_space<vmem>>, %arg7: memref<1x128xf32, #tpu.memory_space<vmem>>, %arg8: memref<128x128xf32, #tpu.memory_space<vmem>>, %arg9: memref<1x128xf32, #tpu.memory_space<vmem>>, %arg10: memref<8x128xf32, #tpu.memory_space<vmem>>) attributes {dimension_semantics = [#tpu.dimension_semantics<parallel>], iteration_bounds = array<i64: 1>, scalar_prefetch = 0 : i64, scratch_operands = 0 : i64, tpu.core_type = #tpu.core_type<tc>, window_params = [{transform_indices = @transform_0, window_bounds = array<i64: 8, 128>}, {pipeline_mode = #tpu.pipeline_mode<synchronous>, transform_indices = @transform_1, window_bounds = array<i64: 128, 128>}, {pipeline_mode = #tpu.pipeline_mode<synchronous>, transform_indices = @transform_2, window_bounds = array<i64: 1, 128>}, {pipeline_mode = #tpu.pipeline_mode<synchronous>, transform_indices = @transform_3, window_bounds = array<i64: 128, 128>}, {pipeline_mode = #tpu.pipeline_mode<synchronous>, transform_indices = @transform_4, window_bounds = array<i64: 1, 128>}, {pipeline_mode = #tpu.pipeline_mode<synchronous>, transform_indices = @transform_5, window_bounds = array<i64: 128, 128>}, {pipeline_mode = #tpu.pipeline_mode<synchronous>, transform_indices = @transform_6, window_bounds = array<i64: 1, 128>}, {pipeline_mode = #tpu.pipeline_mode<synchronous>, transform_indices = @transform_7, window_bounds = array<i64: 128, 128>}, {pipeline_mode = #tpu.pipeline_mode<synchronous>, transform_indices = @transform_8, window_bounds = array<i64: 1, 128>}, {transform_indices = @transform_9, window_bounds = array<i64: 8, 128>}]} {
    %c0 = arith.constant 0 : index
    %c0_0 = arith.constant 0 : index
    %0 = vector.load %arg1[%c0, %c0_0] : memref<8x128xf32, #tpu.memory_space<vmem>>, vector<8x128xf32>
    %c0_1 = arith.constant 0 : index
    %c0_2 = arith.constant 0 : index
    %1 = vector.load %arg2[%c0_1, %c0_2] : memref<128x128xf32, #tpu.memory_space<vmem>>, vector<128x128xf32>
    %cst = arith.constant dense<0.000000e+00> : vector<8x128xf32>
    %2 = tpu.matmul %0, %1, %cst {dimension_numbers = #tpu.dot_dimension_numbers<[1], [0], [0], [1], [0, 0, 1, 1], [], []>} : vector<8x128xf32>, vector<128x128xf32>, vector<8x128xf32> -> vector<8x128xf32>
    %c0_3 = arith.constant 0 : index
    %c0_4 = arith.constant 0 : index
    %3 = vector.load %arg3[%c0_3, %c0_4] : memref<1x128xf32, #tpu.memory_space<vmem>>, vector<1x128xf32>
    %4 = vector.broadcast %3 : vector<1x128xf32> to vector<8x128xf32>
    %5 = arith.addf %2, %4 : vector<8x128xf32>
    %6 = math.tanh %5 : vector<8x128xf32>
    %c0_5 = arith.constant 0 : index
    %c0_6 = arith.constant 0 : index
    %7 = vector.load %arg4[%c0_5, %c0_6] : memref<128x128xf32, #tpu.memory_space<vmem>>, vector<128x128xf32>
    %cst_7 = arith.constant dense<0.000000e+00> : vector<8x128xf32>
    %8 = tpu.matmul %6, %7, %cst_7 {dimension_numbers = #tpu.dot_dimension_numbers<[1], [0], [0], [1], [0, 0, 1, 1], [], []>} : vector<8x128xf32>, vector<128x128xf32>, vector<8x128xf32> -> vector<8x128xf32>
    %c0_8 = arith.constant 0 : index
    %c0_9 = arith.constant 0 : index
    %9 = vector.load %arg5[%c0_8, %c0_9] : memref<1x128xf32, #tpu.memory_space<vmem>>, vector<1x128xf32>
    %10 = vector.broadcast %9 : vector<1x128xf32> to vector<8x128xf32>
    %11 = arith.addf %8, %10 : vector<8x128xf32>
    %12 = math.tanh %11 : vector<8x128xf32>
    %c0_10 = arith.constant 0 : index
    %c0_11 = arith.constant 0 : index
    %13 = vector.load %arg6[%c0_10, %c0_11] : memref<128x128xf32, #tpu.memory_space<vmem>>, vector<128x128xf32>
    %cst_12 = arith.constant dense<0.000000e+00> : vector<8x128xf32>
    %14 = tpu.matmul %12, %13, %cst_12 {dimension_numbers = #tpu.dot_dimension_numbers<[1], [0], [0], [1], [0, 0, 1, 1], [], []>} : vector<8x128xf32>, vector<128x128xf32>, vector<8x128xf32> -> vector<8x128xf32>
    %c0_13 = arith.constant 0 : index
    %c0_14 = arith.constant 0 : index
    %15 = vector.load %arg7[%c0_13, %c0_14] : memref<1x128xf32, #tpu.memory_space<vmem>>, vector<1x128xf32>
    %16 = vector.broadcast %15 : vector<1x128xf32> to vector<8x128xf32>
    %17 = arith.addf %14, %16 : vector<8x128xf32>
    %18 = math.tanh %17 : vector<8x128xf32>
    %c0_15 = arith.constant 0 : index
    %c0_16 = arith.constant 0 : index
    %19 = vector.load %arg8[%c0_15, %c0_16] : memref<128x128xf32, #tpu.memory_space<vmem>>, vector<128x128xf32>
    %cst_17 = arith.constant dense<0.000000e+00> : vector<8x128xf32>
    %20 = tpu.matmul %18, %19, %cst_17 {dimension_numbers = #tpu.dot_dimension_numbers<[1], [0], [0], [1], [0, 0, 1, 1], [], []>} : vector<8x128xf32>, vector<128x128xf32>, vector<8x128xf32> -> vector<8x128xf32>
    %c0_18 = arith.constant 0 : index
    %c0_19 = arith.constant 0 : index
    %21 = vector.load %arg9[%c0_18, %c0_19] : memref<1x128xf32, #tpu.memory_space<vmem>>, vector<1x128xf32>
    %22 = vector.broadcast %21 : vector<1x128xf32> to vector<8x128xf32>
    %23 = arith.addf %20, %22 : vector<8x128xf32>
    %c0_20 = arith.constant 0 : index
    %c0_21 = arith.constant 0 : index
    %24 = vector.load %arg10[%c0_20, %c0_21] : memref<8x128xf32, #tpu.memory_space<vmem>>, vector<8x128xf32>
    tpu.vector_store %arg10[%c0_20, %c0_21], %23 {strides = array<i32>} : memref<8x128xf32, #tpu.memory_space<vmem>>, vector<8x128xf32>,
    return
  }
  func.func @transform_0(%arg0: i32) -> (i32, i32) {
    %c0_i32 = arith.constant 0 : i32
    %c0_i32_0 = arith.constant 0 : i32
    return %arg0, %c0_i32 : i32, i32
  }
  func.func @transform_1(%arg0: i32) -> (i32, i32) {
    %c0_i32 = arith.constant 0 : i32
    %c0_i32_0 = arith.constant 0 : i32
    %c0_i32_1 = arith.constant 0 : i32
    return %c0_i32, %c0_i32_0 : i32, i32
  }
  func.func @transform_2(%arg0: i32) -> (i32, i32) {
    %c0_i32 = arith.constant 0 : i32
    %c0_i32_0 = arith.constant 0 : i32
    %c0_i32_1 = arith.constant 0 : i32
    return %c0_i32, %c0_i32_0 : i32, i32
  }
  func.func @transform_3(%arg0: i32) -> (i32, i32) {
    %c0_i32 = arith.constant 0 : i32
    %c0_i32_0 = arith.constant 0 : i32
    %c0_i32_1 = arith.constant 0 : i32
    return %c0_i32, %c0_i32_0 : i32, i32
  }
  func.func @transform_4(%arg0: i32) -> (i32, i32) {
    %c0_i32 = arith.constant 0 : i32
    %c0_i32_0 = arith.constant 0 : i32
    %c0_i32_1 = arith.constant 0 : i32
    return %c0_i32, %c0_i32_0 : i32, i32
  }
  func.func @transform_5(%arg0: i32) -> (i32, i32) {
    %c0_i32 = arith.constant 0 : i32
    %c0_i32_0 = arith.constant 0 : i32
    %c0_i32_1 = arith.constant 0 : i32
    return %c0_i32, %c0_i32_0 : i32, i32
  }
  func.func @transform_6(%arg0: i32) -> (i32, i32) {
    %c0_i32 = arith.constant 0 : i32
    %c0_i32_0 = arith.constant 0 : i32
    %c0_i32_1 = arith.constant 0 : i32
    return %c0_i32, %c0_i32_0 : i32, i32
  }
  func.func @transform_7(%arg0: i32) -> (i32, i32) {
    %c0_i32 = arith.constant 0 : i32
    %c0_i32_0 = arith.constant 0 : i32
    %c0_i32_1 = arith.constant 0 : i32
    return %c0_i32, %c0_i32_0 : i32, i32
  }
  func.func @transform_8(%arg0: i32) -> (i32, i32) {
    %c0_i32 = arith.constant 0 : i32
    %c0_i32_0 = arith.constant 0 : i32
    %c0_i32_1 = arith.constant 0 : i32
    return %c0_i32, %c0_i32_0 : i32, i32
  }
  func.func @transform_9(%arg0: i32) -> (i32, i32) {
    %c0_i32 = arith.constant 0 : i32
    %c0_i32_0 = arith.constant 0 : i32
    return %arg0, %c0_i32 : i32, i32
  }
}

</mosaic_0001>

<bundles_post_ra>
// kernel: tpu_custom_call.1
= control target key start
LH: loop header
LB: loop body
LE: loop exit
PB: predicated region body
PF: predicated region fallthrough
CT: control target
= control target key end

     0   :  { %14 = vsyncpa [#allocation3], 0  ;;  %s551_s0 = inlined_call_operand.hbm [shape: f32[8,128], index: 0, kind: input, shape index: {}]   ;;  %s552_s1 = inlined_call_operand.hbm [shape: f32[128,128], index: 1, kind: input, shape index: {}]   ;;  %s553_s2 = inlined_call_operand.vmem [shape: f32[1,128], index: 2, kind: input, shape index: {}]   ;;  %s554_s3 = inlined_call_operand.hbm [shape: f32[128,128], index: 3, kind: input, shape index: {}]   ;;  %s555_s4 = inlined_call_operand.vmem [shape: f32[1,128], index: 4, kind: input, shape index: {}]   ;;  %s556_s5 = inlined_call_operand.hbm [shape: f32[128,128], index: 5, kind: input, shape index: {}]   ;;  %s557_s6 = inlined_call_operand.vmem [shape: f32[1,128], index: 6, kind: input, shape index: {}]   ;;  %s558_s7 = inlined_call_operand.hbm [shape: f32[128,128], index: 7, kind: input, shape index: {}]   ;;  %s559_s8 = inlined_call_operand.vmem [shape: f32[1,128], index: 8, kind: input, shape index: {}]   ;;  %s560_s9 = inlined_call_operand.hbm [shape: f32[8,128], index: 9, kind: output, shape index: {}]  }
   0x1   :  { %15 = vsyncpa [#allocation6], 0 }
   0x2   :  { %16 = vsyncpa [#allocation9], 0  ;;  %s33_s11 = sshll.u32 %s552_s1, 4  ;;  %s34_s11 = int_to_ptr.hbm [resolvable:$true] %s33_s11 }
   0x3   :  { %17 = vsyncpa [#allocation4], 0  ;;  %s463_s12 = smov [#allocation5]   ;;  %s63_s16 = sshll.u32 %s556_s5, 4  ;;  %s64_s16 = int_to_ptr.hbm [resolvable:$true] %s63_s16 }
   0x4   :  { %s35_s13 = sshll.u32 %s463_s12, 4  ;;  %s464_s17 = smov 128   ;;  %s36_s13 = int_to_ptr.vmem [resolvable:$true] %s35_s13 }
   0x5   :  { %s465_s18 = smov 8   ;;  %s466_s19 = smov [#allocation8]  }
   0x6   :  { %41 = dma.hbm_to_vmem [thread:$0]  %s34_s11, 2048, %s36_s13, [#allocation6], %s464_s17, %s464_s17, %s465_s18  }
   0x7   :  { %s65_s20 = sshll.u32 %s466_s19, 4  ;;  %s23_s23 = sshll.u32 %s551_s0, 4  ;;  %s66_s20 = int_to_ptr.vmem [resolvable:$true] %s65_s20  ;;  %s24_s23 = int_to_ptr.hbm [resolvable:$true] %s23_s23 }
   0x8   :  { %71 = dma.hbm_to_vmem [thread:$0]  %s64_s16, 2048, %s66_s20, [#allocation9], %s464_s17, %s464_s17, %s465_s18  }
   0x9   :  { %s48_s25 = sshll.u32 %s554_s3, 4  ;;  %s467_s26 = smov [#allocation2]   ;;  %s49_s25 = int_to_ptr.hbm [resolvable:$true] %s48_s25 }
   0xa   :  { %s25_s27 = sshll.u32 %s467_s26, 4  ;;  %s468_s5 = smov [#allocation7]   ;;  %s26_s27 = int_to_ptr.vmem [resolvable:$true] %s25_s27 }
   0xb   :  { %28 = dma.hbm_to_vmem [thread:$0]  %s24_s23, 128, %s26_s27, [#allocation3]  }
   0xc   :  { %s50_s28 = sshll.u32 %s468_s5, 4  ;;  %s78_s10 = sshll.u32 %s558_s7, 4  ;;  %s51_s28 = int_to_ptr.vmem [resolvable:$true] %s50_s28  ;;  %s79_s10 = int_to_ptr.hbm [resolvable:$true] %s78_s10 }
   0xd   :  { %56 = dma.hbm_to_vmem [thread:$0]  %s49_s25, 2048, %s51_s28, [#allocation6], %s464_s17, %s464_s17, %s465_s18  }
   0xe   :  { %s469_s0 = smov [#allocation10]  }
   0xf   :  { %s80_s11 = sshll.u32 %s469_s0, 4  ;;  %s81_s11 = int_to_ptr.vmem [resolvable:$true] %s80_s11 }
  0x10   :  { %86 = dma.hbm_to_vmem [thread:$0]  %s79_s10, 2048, %s81_s11, [#allocation9], %s464_s17, %s464_s17, %s465_s18  }
  0x11   :  { %455 = dma.done.wait [#allocation3], 128  }
  0x12   :  { %456 = vsyncadd [#allocation3], 4294967168 }
  0x13   :  { %457 = dma.done.wait [#allocation6], 4096  }
  0x14   :  { %458 = vsyncadd [#allocation6], 4294963200 }
  0x15   :  { %459 = dma.done.wait [#allocation9], 4096  }
  0x16   :  { %460 = vsyncadd [#allocation9], 4294963200  ;;  %v125_v0 = vld [vmem:[#allocation5 + $0x78] sm:$0xff]  ;;  %v124_v1 = vld [vmem:[#allocation5 + $0x70] sm:$0xff]  ;;  %s470_s16 = smov [#allocation11]   ;;  %s281_s20 = sshll.u32 %s560_s9, 4  ;;  %s282_s20 = int_to_ptr.hbm [resolvable:$true] %s281_s20 }
  0x17   :  { %130 = vmatpush.msra.mxu0 %v125_v0  ;;  %v123_v2 = vld [vmem:[#allocation5 + $0x68] sm:$0xff]  ;;  %v122_v3 = vld [vmem:[#allocation5 + $0x60] sm:$0xff]  ;;  %v166_v4 = vld [vmem:[#allocation7 + $0x78] sm:$0xff]  ;;  %s279_s17 = sshll.u32 %s470_s16, 4  ;;  %s280_s17 = int_to_ptr.vmem [resolvable:$true] %s279_s17 }
  0x18   :  { %v121_v5 = vld [vmem:[#allocation5 + $0x58] sm:$0xff]  ;;  %171 = vmatpush.msra.mxu1 %v166_v4  ;;  %v165_v6 = vld [vmem:[#allocation7 + $0x70] sm:$0xff]  ;;  %v164_v7 = vld [vmem:[#allocation7 + $0x68] sm:$0xff] }
  0x19   :  { %131 = vmatpush.msra.mxu0 %v124_v1  ;;  %v120_v8 = vld [vmem:[#allocation5 + $0x50] sm:$0xff]  ;;  %v119_v9 = vld [vmem:[#allocation5 + $0x48] sm:$0xff]  ;;  %v163_v10 = vld [vmem:[#allocation7 + $0x60] sm:$0xff] }
  0x1a   :  { %172 = vmatpush.msra.mxu1 %v165_v6  ;;  %v162_v11 = vld [vmem:[#allocation7 + $0x58] sm:$0xff]  ;;  %v118_v12 = vld [vmem:[#allocation5 + $0x40] sm:$0xff]  ;;  %v161_v13 = vld [vmem:[#allocation7 + $0x50] sm:$0xff] }
  0x1b   :  { %132 = vmatpush.msra.mxu0 %v123_v2  ;;  %v117_v14 = vld [vmem:[#allocation5 + $0x38] sm:$0xff]  ;;  %v160_v15 = vld [vmem:[#allocation7 + $0x48] sm:$0xff]  ;;  %v116_v16 = vld [vmem:[#allocation5 + $0x30] sm:$0xff] }
  0x1c   :  { %173 = vmatpush.msra.mxu1 %v164_v7  ;;  %v159_v17 = vld [vmem:[#allocation7 + $0x40] sm:$0xff]  ;;  %v115_v18 = vld [vmem:[#allocation5 + $0x28] sm:$0xff]  ;;  %v158_v19 = vld [vmem:[#allocation7 + $0x38] sm:$0xff] }
  0x1d   :  { %133 = vmatpush.msra.mxu0 %v122_v3  ;;  %v114_v20 = vld [vmem:[#allocation5 + $0x20] sm:$0xff]  ;;  %v157_v21 = vld [vmem:[#allocation7 + $0x30] sm:$0xff]  ;;  %v113_v22 = vld [vmem:[#allocation5 + $0x18] sm:$0xff] }
  0x1e   :  { %174 = vmatpush.msra.mxu1 %v163_v10  ;;  %v156_v23 = vld [vmem:[#allocation7 + $0x28] sm:$0xff]  ;;  %v112_v24 = vld [vmem:[#allocation5 + $0x10] sm:$0xff]  ;;  %v110_v26 = vld [vmem:[#allocation5] sm:$0xff] }
  0x1f   :  { %134 = vmatpush.msra.mxu0 %v121_v5  ;;  %v111_v25 = vld [vmem:[#allocation5 + $0x8] sm:$0xff]  ;;  %v109_v27 = vld [vmem:[#allocation2] sm:$0xff]  ;;  %v155_v28 = vld [vmem:[#allocation7 + $0x20] sm:$0xff] }
  0x20   :  { %175 = vmatpush.msra.mxu1 %v162_v11  ;;  %v154_v29 = vld [vmem:[#allocation7 + $0x18] sm:$0xff]  ;;  %v153_v30 = vld [vmem:[#allocation7 + $0x10] sm:$0xff]  ;;  %v152_v31 = vld [vmem:[#allocation7 + $0x8] sm:$0xff] }
  0x21   :  { %135 = vmatpush.msra.mxu0 %v120_v8  ;;  %v151_v32 = vld [vmem:[#allocation7] sm:$0xff]  ;;  %v207_v33 = vld [vmem:[#allocation8 + $0x78] sm:$0xff]  ;;  %v206_v34 = vld [vmem:[#allocation8 + $0x70] sm:$0xff] }
  0x22   :  { %176 = vmatpush.msra.mxu1 %v161_v13  ;;  %212 = vmatpush.msra.mxu2 %v207_v33  ;;  %v205_v35 = vld [vmem:[#allocation8 + $0x68] sm:$0xff]  ;;  %v204_v36 = vld [vmem:[#allocation8 + $0x60] sm:$0xff]  ;;  %v203_v37 = vld [vmem:[#allocation8 + $0x58] sm:$0xff] }
  0x23   :  { %136 = vmatpush.msra.mxu0 %v119_v9  ;;  %v202_v38 = vld [vmem:[#allocation8 + $0x50] sm:$0xff]  ;;  %v201_v39 = vld [vmem:[#allocation8 + $0x48] sm:$0xff]  ;;  %v200_v40 = vld [vmem:[#allocation8 + $0x40] sm:$0xff] }
  0x24   :  { %177 = vmatpush.msra.mxu1 %v160_v15  ;;  %213 = vmatpush.msra.mxu2 %v206_v34  ;;  %v199_v41 = vld [vmem:[#allocation8 + $0x38] sm:$0xff]  ;;  %v198_v42 = vld [vmem:[#allocation8 + $0x30] sm:$0xff]  ;;  %v197_v43 = vld [vmem:[#allocation8 + $0x28] sm:$0xff] }
  0x25   :  { %137 = vmatpush.msra.mxu0 %v118_v12  ;;  %v301_v44 = vld [vmem:[%s553_s2] ss:$0 sm:$0xff]  ;;  %v196_v48 = vld [vmem:[#allocation8 + $0x20] sm:$0xff]  ;;  %v194_v50 = vld [vmem:[#allocation8 + $0x10] sm:$0xff] }
  0x26   :  { %178 = vmatpush.msra.mxu1 %v159_v17  ;;  %214 = vmatpush.msra.mxu2 %v205_v35  ;;  %v195_v49 = vld [vmem:[#allocation8 + $0x18] sm:$0xff]  ;;  %v193_v51 = vld [vmem:[#allocation8 + $0x8] sm:$0xff]  ;;  %v192_v52 = vld [vmem:[#allocation8] sm:$0xff] }
  0x27   :  { %138 = vmatpush.msra.mxu0 %v117_v14  ;;  %v248_v53 = vld [vmem:[#allocation10 + $0x78] sm:$0xff]  ;;  %v247_v54 = vld [vmem:[#allocation10 + $0x70] sm:$0xff]  ;;  %v246_v55 = vld [vmem:[#allocation10 + $0x68] sm:$0xff] }
  0x28   :  { %179 = vmatpush.msra.mxu1 %v158_v19  ;;  %215 = vmatpush.msra.mxu2 %v204_v36  ;;  %v245_v56 = vld [vmem:[#allocation10 + $0x60] sm:$0xff]  ;;  %v244_v57 = vld [vmem:[#allocation10 + $0x58] sm:$0xff]  ;;  %v243_v58 = vld [vmem:[#allocation10 + $0x50] sm:$0xff] }
  0x29   :  { %139 = vmatpush.msra.mxu0 %v116_v16  ;;  %253 = vmatpush.msra.mxu3 %v248_v53  ;;  %v242_v59 = vld [vmem:[#allocation10 + $0x48] sm:$0xff]  ;;  %v241_v60 = vld [vmem:[#allocation10 + $0x40] sm:$0xff]  ;;  %v240_v61 = vld [vmem:[#allocation10 + $0x38] sm:$0xff] }
  0x2a   :  { %180 = vmatpush.msra.mxu1 %v157_v21  ;;  %216 = vmatpush.msra.mxu2 %v203_v37  ;;  %v239_v62 = vld [vmem:[#allocation10 + $0x30] sm:$0xff]  ;;  %v238_v63 = vld [vmem:[#allocation10 + $0x28] sm:$0xff]  ;;  %v302_v0 = vld [vmem:[%s555_s4] ss:$0 sm:$0xff] }
  0x2b   :  { %140 = vmatpush.msra.mxu0 %v115_v18  ;;  %254 = vmatpush.msra.mxu3 %v247_v54  ;;  %v237_v4 = vld [vmem:[#allocation10 + $0x20] sm:$0xff]  ;;  %v236_v5 = vld [vmem:[#allocation10 + $0x18] sm:$0xff]  ;;  %v235_v6 = vld [vmem:[#allocation10 + $0x10] sm:$0xff] }
  0x2c   :  { %181 = vmatpush.msra.mxu1 %v156_v23  ;;  %217 = vmatpush.msra.mxu2 %v202_v38  ;;  %v234_v7 = vld [vmem:[#allocation10 + $0x8] sm:$0xff]  ;;  %v233_v8 = vld [vmem:[#allocation10] sm:$0xff]  ;;  %v303_v9 = vld [vmem:[%s557_s6] ss:$0 sm:$0xff] }
  0x2d   :  { %141 = vmatpush.msra.mxu0 %v114_v20  ;;  %255 = vmatpush.msra.mxu3 %v246_v55  ;;  %v304_v13 = vld [vmem:[%s559_s8] ss:$0 sm:$0xff] }
  0x2e   :  { %182 = vmatpush.msra.mxu1 %v155_v28  ;;  %218 = vmatpush.msra.mxu2 %v201_v39 }
  0x2f   :  { %142 = vmatpush.msra.mxu0 %v113_v22  ;;  %256 = vmatpush.msra.mxu3 %v245_v56 }
  0x30   :  { %183 = vmatpush.msra.mxu1 %v154_v29  ;;  %219 = vmatpush.msra.mxu2 %v200_v40 }
  0x31   :  { %143 = vmatpush.msra.mxu0 %v112_v24  ;;  %257 = vmatpush.msra.mxu3 %v244_v57 }
  0x32   :  { %184 = vmatpush.msra.mxu1 %v153_v30  ;;  %220 = vmatpush.msra.mxu2 %v199_v41 }
  0x33   :  { %144 = vmatpush.msra.mxu0 %v111_v25  ;;  %258 = vmatpush.msra.mxu3 %v243_v58 }
  0x34   :  { %185 = vmatpush.msra.mxu1 %v152_v31  ;;  %221 = vmatpush.msra.mxu2 %v198_v42 }
  0x35   :  { %145 = vmatpush.msra.mxu0 %v110_v26  ;;  %259 = vmatpush.msra.mxu3 %v242_v59 }
  0x36   :  { %146 = vmatmul.f32.vlgmr.msra.gmra.mxu0 %v109_v27  ;;  %186 = vmatpush.msra.mxu1 %v151_v32 }
  0x37   :  { %222 = vmatpush.msra.mxu2 %v197_v43  ;;  %260 = vmatpush.msra.mxu3 %v241_v60 }
  0x39   :  { %223 = vmatpush.msra.mxu2 %v196_v48  ;;  %261 = vmatpush.msra.mxu3 %v240_v61 }
  0x3b   :  { %224 = vmatpush.msra.mxu2 %v195_v49  ;;  %262 = vmatpush.msra.mxu3 %v239_v62 }
  0x3d   :  { %225 = vmatpush.msra.mxu2 %v194_v50  ;;  %263 = vmatpush.msra.mxu3 %v238_v63 }
  0x3f   :  { %226 = vmatpush.msra.mxu2 %v193_v51  ;;  %264 = vmatpush.msra.mxu3 %v237_v4 }
  0x41   :  { %227 = vmatpush.msra.mxu2 %v192_v52  ;;  %265 = vmatpush.msra.mxu3 %v236_v5 }
  0x43   :  { %266 = vmatpush.msra.mxu3 %v235_v6 }
  0x45   :  { %267 = vmatpush.msra.mxu3 %v234_v7 }
  0x47   :  { %268 = vmatpush.msra.mxu3 %v233_v8 }
  0xb3   :  { %v147_v45 = vpop.f32.mrf.mxu0 }
  0xb4   :  { %v148_v46 = vadd.f32 %v301_v44, %v147_v45 }
  0xb6   :  { %305 = vtanh.f32 %v148_v46 }
  0xbc   :  { %v306_v47 = vpop.eup %305 }
  0xbd   :  { %187 = vmatmul.f32.vlgmr.msra.gmra.mxu1 %v306_v47 }
 0x13a   :  { %v188_v1 = vpop.f32.mrf.mxu1 }
 0x13b   :  { %v189_v2 = vadd.f32 %v302_v0, %v188_v1 }
 0x13d   :  { %307 = vtanh.f32 %v189_v2 }
 0x143   :  { %v308_v3 = vpop.eup %307 }
 0x144   :  { %228 = vmatmul.f32.vlgmr.msra.gmra.mxu2 %v308_v3 }
 0x1c7   :  { %v229_v10 = vpop.f32.mrf.mxu2 }
 0x1c8   :  { %v230_v11 = vadd.f32 %v303_v9, %v229_v10 }
 0x1ca   :  { %309 = vtanh.f32 %v230_v11 }
 0x1d0   :  { %v310_v12 = vpop.eup %309 }
 0x1d1   :  { %269 = vmatmul.f32.vlgmr.msra.gmra.mxu3 %v310_v12 }
 0x254   :  { %v270_v14 = vpop.f32.mrf.mxu3 }
 0x255   :  { %v271_v15 = vadd.f32 %v304_v13, %v270_v14 }
 0x257   :  { %273 = vst [vmem:[#allocation11] sm:$0xff] %v271_v15 }
 0x258   :  { %284 = dma.vmem_to_hbm [thread:$0]  %s280_s17, 128, %s282_s20, [#allocation4]  }
 0x259   :  { %461 = dma.done.wait [#allocation4], 128  }
 0x25a   :  { %462 = vsyncadd [#allocation4], 4294967168 }
 0x25b   :  { %289 = vsyncpa [#allocation3], 1 }
 0x25c   :  { %290 = vsyncpa [#allocation6], 1 }
 0x25d   :  { %291 = vsyncpa [#allocation9], 1 }
 0x25e   :  { %292 = vsyncpa [#allocation4], 1 }

</bundles_post_ra>
